<compile_context>
chip_gen: v7x
topology: tpu7x:2x2x1
jax: 0.10.0
libtpu: 0.0.40
codegen_flags: <defaults>
</compile_context>

<pallas_src>
import functools

import jax
import jax.numpy as jnp
from jax import lax
from jax.experimental import pallas as pl
from jax.experimental.pallas import tpu as pltpu

KLD_WEIGHT = 0.05        # base_kld_weight / eval_kld_weight, schedule_type='constant'
NORM_EPS = 1e-12         # F.normalize default eps
_DEFAULT_TILE_B = 1024   # rows per grid step (large tiles amortize per-step overhead)
_VMEM_SOFT_BUDGET = 20 * 1024 * 1024   # double-buffered working-set cap (v7x-safe)


def _vae_loss_kernel(out_ref, tgt_ref, mu_ref, lv_ref, pdir_ref, tdir_ref,
                     part_ref, dev_ref):
    """One batch tile: MSE/KLD partial sums + lane-dense direction deviations."""
    out = out_ref[...].astype(jnp.float32)       # (tile_b, D)
    tgt = tgt_ref[...].astype(jnp.float32)       # (tile_b, D)
    mu = mu_ref[...].astype(jnp.float32)         # (tile_b, L)
    lv = lv_ref[...].astype(jnp.float32)         # (tile_b, L)

    # --- per-tile partial sums (zero-padded rows contribute exactly 0) ---
    diff = out - tgt
    recon_sum = jnp.sum(diff * diff)
    kld_sum = jnp.sum(1.0 + lv - mu * mu - jnp.exp(lv))

    # Pack the two scalars into a lane-aligned (1, 8, 128) block:
    #   [0, 0, 0] = sum((out-tgt)^2),  [0, 0, 1] = sum(1 + lv - mu^2 - exp(lv))
    sub = lax.broadcasted_iota(jnp.int32, part_ref.shape, 1)
    lane = lax.broadcasted_iota(jnp.int32, part_ref.shape, 2)
    part_ref[...] = jnp.where(
        (sub == 0) & (lane == 0), recon_sum,
        jnp.where((sub == 0) & (lane == 1), kld_sum, 0.0))

    # --- direction deviations, transposed layout (3, tile_b): batch on lanes ---
    pd = pdir_ref[...].astype(jnp.float32)       # (3, tile_b)
    td = tdir_ref[...].astype(jnp.float32)       # (3, tile_b)
    # F.normalize: x / max(||x||, eps)  ==  x * min(rsqrt(sum x^2), 1/eps)
    inv_p = jnp.minimum(lax.rsqrt(jnp.sum(pd * pd, axis=0, keepdims=True)),
                        1.0 / NORM_EPS)
    inv_t = jnp.minimum(lax.rsqrt(jnp.sum(td * td, axis=0, keepdims=True)),
                        1.0 / NORM_EPS)
    dev_ref[...] = jnp.abs(pd * inv_p - td * inv_t)


def _pick_tile_b(B, D, L, itemsize, requested):
    """Choose the batch tile: as large as comfortably fits the VMEM budget."""
    tile = _DEFAULT_TILE_B if requested is None else int(requested)
    if B <= tile:
        return B   # single tile: block == full array, no padding/alignment needed
    # Multi-tile path: the transposed deviation blocks put the batch tile on the
    # 128-lane axis, so the tile must be a multiple of 128.
    tile = max(128, (tile // 128) * 128)

    def tile_bytes(t):  # double-buffered inputs + dir views + outputs
        per_row = (2 * D + 6) * itemsize + 2 * L * itemsize + 3 * 4
        return 2 * (t * per_row + 8 * 128 * 4)

    while tile > 128 and tile_bytes(tile) > _VMEM_SOFT_BUDGET:
        tile = max(128, ((tile // 2) // 128) * 128)
    return tile


@functools.partial(jax.jit, static_argnames=("tile_b",))
def vae_loss(outputs, targets, mu, logvar, kld_weight=KLD_WEIGHT, *, tile_b=None):
    """Returns (total_loss scalar f32, deviations [B, 3] f32)."""
    B, D = outputs.shape
    L = mu.shape[1]
    if D < 3:
        raise ValueError("outputs/targets must have at least 3 feature columns")

    itemsize = jnp.dtype(outputs.dtype).itemsize
    tb = _pick_tile_b(B, D, L, itemsize, tile_b)
    num_tiles = -(-B // tb)            # cdiv
    b_pad = num_tiles * tb
    pad = b_pad - B

    if pad:
        # Zero rows contribute exactly 0 to both partial sums:
        #   (0 - 0)^2 = 0   and   1 + 0 - 0 - exp(0) = 0.
        # Padded deviation columns are sliced off below.
        outputs = jnp.pad(outputs, ((0, pad), (0, 0)))
        targets = jnp.pad(targets, ((0, pad), (0, 0)))
        mu = jnp.pad(mu, ((0, pad), (0, 0)))
        logvar = jnp.pad(logvar, ((0, pad), (0, 0)))

    # Transposed [3, B_pad] views of the direction columns so the deviation
    # output is lane-dense (layout plumbing; the slices are tiny).
    pdir = jnp.transpose(outputs[:, :3])
    tdir = jnp.transpose(targets[:, :3])

    per_tile_bytes = tb * ((2 * D + 6) * itemsize + 2 * L * itemsize + 3 * 4) \
        + 8 * 128 * 4
    vmem_limit = int(min(max(4 * per_tile_bytes, 16 * 1024 * 1024),
                         40 * 1024 * 1024))

    partials, dev_t = pl.pallas_call(
        _vae_loss_kernel,
        out_shape=(
            jax.ShapeDtypeStruct((num_tiles, 8, 128), jnp.float32),  # partial sums
            jax.ShapeDtypeStruct((3, b_pad), jnp.float32),           # deviations^T
        ),
        grid_spec=pltpu.PrefetchScalarGridSpec(
            num_scalar_prefetch=0,
            grid=(num_tiles,),
            in_specs=[
                pl.BlockSpec((tb, D), lambda i: (i, 0)),   # outputs
                pl.BlockSpec((tb, D), lambda i: (i, 0)),   # targets
                pl.BlockSpec((tb, L), lambda i: (i, 0)),   # mu
                pl.BlockSpec((tb, L), lambda i: (i, 0)),   # logvar
                pl.BlockSpec((3, tb), lambda i: (0, i)),   # outputs[:, :3]^T
                pl.BlockSpec((3, tb), lambda i: (0, i)),   # targets[:, :3]^T
            ],
            out_specs=[
                pl.BlockSpec((1, 8, 128), lambda i: (i, 0, 0)),
                pl.BlockSpec((3, tb), lambda i: (0, i)),
            ],
        ),
        compiler_params=pltpu.CompilerParams(
            dimension_semantics=("parallel",),   # independent tiles -> megacore
            vmem_limit_bytes=vmem_limit,
        ),
    )(outputs, targets, mu, logvar, pdir, tdir)

    # Tiny final reduction in the wrapper (keeps the grid axis "parallel" and
    # divides by the TRUE element counts, not the padded ones).
    recon_loss = jnp.sum(partials[:, 0, 0]) / (B * D)
    kld_loss = -0.5 * jnp.sum(partials[:, 0, 1]) / (B * L)
    total_loss = recon_loss + kld_weight * kld_loss
    deviations = jnp.transpose(dev_t)[:B]
    return total_loss, deviations


def _reference(outputs, targets, mu, logvar, kld_weight=KLD_WEIGHT):
    recon = jnp.mean((outputs - targets) ** 2)
    kld = -0.5 * jnp.mean(1.0 + logvar - mu ** 2 - jnp.exp(logvar))
    total = recon + kld_weight * kld
    pd, td = outputs[:, :3], targets[:, :3]
    pn = pd / jnp.maximum(jnp.linalg.norm(pd, axis=1, keepdims=True), NORM_EPS)
    tn = td / jnp.maximum(jnp.linalg.norm(td, axis=1, keepdims=True), NORM_EPS)
    return total, jnp.abs(pn - tn)


if __name__ == "__main__":
    keys = jax.random.split(jax.random.PRNGKey(0), 8)

    # --- case 1: tiny batch -> single-tile path -------------------------------
    B, D, L = 8, 8, 32   # batch, action dim (>=3), latent dim
    outputs = jax.random.normal(keys[0], (B, D), dtype=jnp.float32)
    targets = jax.random.normal(keys[1], (B, D), dtype=jnp.float32)
    mu = jax.random.normal(keys[2], (B, L), dtype=jnp.float32)
    logvar = 0.1 * jax.random.normal(keys[3], (B, L), dtype=jnp.float32)

    total, dev = jax.block_until_ready(vae_loss(outputs, targets, mu, logvar))
    ref_total, ref_dev = _reference(outputs, targets, mu, logvar)
    assert jnp.allclose(total, ref_total, rtol=1e-4, atol=1e-5), (total, ref_total)
    assert jnp.allclose(dev, ref_dev, rtol=1e-4, atol=1e-5)

    # --- case 2: tiled + padded path (B=300, tile=128 -> grid of 3, pad to 384)
    B2 = 300
    outputs2 = jax.random.normal(keys[4], (B2, D), dtype=jnp.float32)
    targets2 = jax.random.normal(keys[5], (B2, D), dtype=jnp.float32)
    mu2 = jax.random.normal(keys[6], (B2, L), dtype=jnp.float32)
    logvar2 = 0.1 * jax.random.normal(keys[7], (B2, L), dtype=jnp.float32)

    total2, dev2 = jax.block_until_ready(
        vae_loss(outputs2, targets2, mu2, logvar2, tile_b=128))
    ref_total2, ref_dev2 = _reference(outputs2, targets2, mu2, logvar2)
    assert jnp.allclose(total2, ref_total2, rtol=1e-4, atol=1e-5), (total2, ref_total2)
    assert jnp.allclose(dev2, ref_dev2, rtol=1e-4, atol=1e-5)

    print("KERNEL_OK")
</pallas_src>

<mosaic_0001>
module attributes {stable_mosaic.version = 11 : i64} {
  func.func @_vae_loss_kernel(%arg0: i32, %arg1: memref<8x8xf32, #tpu.memory_space<vmem>>, %arg2: memref<8x8xf32, #tpu.memory_space<vmem>>, %arg3: memref<8x32xf32, #tpu.memory_space<vmem>>, %arg4: memref<8x32xf32, #tpu.memory_space<vmem>>, %arg5: memref<3x8xf32, #tpu.memory_space<vmem>>, %arg6: memref<3x8xf32, #tpu.memory_space<vmem>>, %arg7: memref<1x8x128xf32, #tpu.memory_space<vmem>>, %arg8: memref<3x8xf32, #tpu.memory_space<vmem>>) attributes {dimension_semantics = [#tpu.dimension_semantics<parallel>], iteration_bounds = array<i64: 1>, scalar_prefetch = 0 : i64, scratch_operands = 0 : i64, tpu.core_type = #tpu.core_type<tc>, window_params = [{transform_indices = @transform_0, window_bounds = array<i64: 8, 8>}, {transform_indices = @transform_1, window_bounds = array<i64: 8, 8>}, {transform_indices = @transform_2, window_bounds = array<i64: 8, 32>}, {transform_indices = @transform_3, window_bounds = array<i64: 8, 32>}, {transform_indices = @transform_4, window_bounds = array<i64: 3, 8>}, {transform_indices = @transform_5, window_bounds = array<i64: 3, 8>}, {transform_indices = @transform_6, window_bounds = array<i64: 1, 8, 128>}, {transform_indices = @transform_7, window_bounds = array<i64: 3, 8>}]} {
    %c0 = arith.constant 0 : index
    %c0_0 = arith.constant 0 : index
    %0 = vector.load %arg1[%c0, %c0_0] : memref<8x8xf32, #tpu.memory_space<vmem>>, vector<8x8xf32>
    %c0_1 = arith.constant 0 : index
    %c0_2 = arith.constant 0 : index
    %1 = vector.load %arg2[%c0_1, %c0_2] : memref<8x8xf32, #tpu.memory_space<vmem>>, vector<8x8xf32>
    %c0_3 = arith.constant 0 : index
    %c0_4 = arith.constant 0 : index
    %2 = vector.load %arg3[%c0_3, %c0_4] : memref<8x32xf32, #tpu.memory_space<vmem>>, vector<8x32xf32>
    %c0_5 = arith.constant 0 : index
    %c0_6 = arith.constant 0 : index
    %3 = vector.load %arg4[%c0_5, %c0_6] : memref<8x32xf32, #tpu.memory_space<vmem>>, vector<8x32xf32>
    %4 = arith.subf %0, %1 : vector<8x8xf32>
    %5 = arith.mulf %4, %4 : vector<8x8xf32>
    %6 = vector.shape_cast %5 : vector<8x8xf32> to vector<1x8x8xf32>
    %cst = arith.constant dense<0.000000e+00> : vector<1xf32>
    %7 = vector.multi_reduction <add>, %6, %cst [1, 2] : vector<1x8x8xf32> to vector<1xf32>
    %8 = vector.shape_cast %7 : vector<1xf32> to vector<1x1x1xf32>
    %9 = vector.extract %8[0, 0, 0] : f32 from vector<1x1x1xf32>
    %cst_7 = arith.constant 1.000000e+00 : f32
    %10 = vector.broadcast %cst_7 : f32 to vector<8x32xf32>
    %11 = arith.addf %10, %3 : vector<8x32xf32>
    %12 = arith.mulf %2, %2 : vector<8x32xf32>
    %13 = arith.subf %11, %12 : vector<8x32xf32>
    %14 = math.exp %3 : vector<8x32xf32>
    %15 = arith.subf %13, %14 : vector<8x32xf32>
    %16 = vector.shape_cast %15 : vector<8x32xf32> to vector<1x8x32xf32>
    %cst_8 = arith.constant dense<0.000000e+00> : vector<1xf32>
    %17 = vector.multi_reduction <add>, %16, %cst_8 [1, 2] : vector<1x8x32xf32> to vector<1xf32>
    %18 = vector.shape_cast %17 : vector<1xf32> to vector<1x1x1xf32>
    %19 = vector.extract %18[0, 0, 0] : f32 from vector<1x1x1xf32>
    %20 = tpu.iota {dimensions = array<i32: 1>} : vector<1x8x128xi32>
    %21 = tpu.iota {dimensions = array<i32: 2>} : vector<1x8x128xi32>
    %c0_i32 = arith.constant 0 : i32
    %22 = vector.broadcast %c0_i32 : i32 to vector<1x8x128xi32>
    %23 = arith.cmpi eq, %20, %22 : vector<1x8x128xi32>
    %c0_i32_9 = arith.constant 0 : i32
    %24 = vector.broadcast %c0_i32_9 : i32 to vector<1x8x128xi32>
    %25 = arith.cmpi eq, %21, %24 : vector<1x8x128xi32>
    %26 = arith.andi %23, %25 : vector<1x8x128xi1>
    %c0_i32_10 = arith.constant 0 : i32
    %27 = vector.broadcast %c0_i32_10 : i32 to vector<1x8x128xi32>
    %28 = arith.cmpi eq, %20, %27 : vector<1x8x128xi32>
    %c1_i32 = arith.constant 1 : i32
    %29 = vector.broadcast %c1_i32 : i32 to vector<1x8x128xi32>
    %30 = arith.cmpi eq, %21, %29 : vector<1x8x128xi32>
    %31 = arith.andi %28, %30 : vector<1x8x128xi1>
    %cst_11 = arith.constant 0.000000e+00 : f32
    %32 = vector.broadcast %19 : f32 to vector<1x8x128xf32>
    %33 = vector.broadcast %cst_11 : f32 to vector<1x8x128xf32>
    %34 = arith.select %31, %32, %33 : vector<1x8x128xi1>, vector<1x8x128xf32>
    %35 = vector.broadcast %9 : f32 to vector<1x8x128xf32>
    %36 = arith.select %26, %35, %34 : vector<1x8x128xi1>, vector<1x8x128xf32>
    %c0_12 = arith.constant 0 : index
    %c0_13 = arith.constant 0 : index
    %c0_14 = arith.constant 0 : index
    %37 = vector.load %arg7[%c0_12, %c0_13, %c0_14] : memref<1x8x128xf32, #tpu.memory_space<vmem>>, vector<1x8x128xf32>
    tpu.vector_store %arg7[%c0_12, %c0_13, %c0_14], %36 {strides = array<i32>} : memref<1x8x128xf32, #tpu.memory_space<vmem>>, vector<1x8x128xf32>,
    %c0_15 = arith.constant 0 : index
    %c0_16 = arith.constant 0 : index
    %38 = vector.load %arg5[%c0_15, %c0_16] : memref<3x8xf32, #tpu.memory_space<vmem>>, vector<3x8xf32>
    %c0_17 = arith.constant 0 : index
    %c0_18 = arith.constant 0 : index
    %39 = vector.load %arg6[%c0_17, %c0_18] : memref<3x8xf32, #tpu.memory_space<vmem>>, vector<3x8xf32>
    %40 = arith.mulf %38, %38 : vector<3x8xf32>
    %cst_19 = arith.constant dense<0.000000e+00> : vector<8xf32>
    %41 = vector.multi_reduction <add>, %40, %cst_19 [0] : vector<3x8xf32> to vector<8xf32>
    %42 = vector.shape_cast %41 : vector<8xf32> to vector<1x8xf32>
    %43 = math.rsqrt %42 : vector<1x8xf32>
    %cst_20 = arith.constant 9.99999995E+11 : f32
    %44 = vector.broadcast %cst_20 : f32 to vector<1x8xf32>
    %45 = arith.minimumf %43, %44 : vector<1x8xf32>
    %46 = arith.mulf %39, %39 : vector<3x8xf32>
    %cst_21 = arith.constant dense<0.000000e+00> : vector<8xf32>
    %47 = vector.multi_reduction <add>, %46, %cst_21 [0] : vector<3x8xf32> to vector<8xf32>
    %48 = vector.shape_cast %47 : vector<8xf32> to vector<1x8xf32>
    %49 = math.rsqrt %48 : vector<1x8xf32>
    %cst_22 = arith.constant 9.99999995E+11 : f32
    %50 = vector.broadcast %cst_22 : f32 to vector<1x8xf32>
    %51 = arith.minimumf %49, %50 : vector<1x8xf32>
    %52 = vector.broadcast %45 : vector<1x8xf32> to vector<3x8xf32>
    %53 = arith.mulf %38, %52 : vector<3x8xf32>
    %54 = vector.broadcast %51 : vector<1x8xf32> to vector<3x8xf32>
    %55 = arith.mulf %39, %54 : vector<3x8xf32>
    %56 = arith.subf %53, %55 : vector<3x8xf32>
    %57 = math.absf %56 : vector<3x8xf32>
    %c0_23 = arith.constant 0 : index
    %c0_24 = arith.constant 0 : index
    %58 = vector.load %arg8[%c0_23, %c0_24] : memref<3x8xf32, #tpu.memory_space<vmem>>, vector<3x8xf32>
    tpu.vector_store %arg8[%c0_23, %c0_24], %57 {strides = array<i32>} : memref<3x8xf32, #tpu.memory_space<vmem>>, vector<3x8xf32>,
    return
  }
  func.func @transform_0(%arg0: i32) -> (i32, i32) {
    %c0_i32 = arith.constant 0 : i32
    %c0_i32_0 = arith.constant 0 : i32
    return %arg0, %c0_i32 : i32, i32
  }
  func.func @transform_1(%arg0: i32) -> (i32, i32) {
    %c0_i32 = arith.constant 0 : i32
    %c0_i32_0 = arith.constant 0 : i32
    return %arg0, %c0_i32 : i32, i32
  }
  func.func @transform_2(%arg0: i32) -> (i32, i32) {
    %c0_i32 = arith.constant 0 : i32
    %c0_i32_0 = arith.constant 0 : i32
    return %arg0, %c0_i32 : i32, i32
  }
  func.func @transform_3(%arg0: i32) -> (i32, i32) {
    %c0_i32 = arith.constant 0 : i32
    %c0_i32_0 = arith.constant 0 : i32
    return %arg0, %c0_i32 : i32, i32
  }
  func.func @transform_4(%arg0: i32) -> (i32, i32) {
    %c0_i32 = arith.constant 0 : i32
    %c0_i32_0 = arith.constant 0 : i32
    return %c0_i32, %arg0 : i32, i32
  }
  func.func @transform_5(%arg0: i32) -> (i32, i32) {
    %c0_i32 = arith.constant 0 : i32
    %c0_i32_0 = arith.constant 0 : i32
    return %c0_i32, %arg0 : i32, i32
  }
  func.func @transform_6(%arg0: i32) -> (i32, i32, i32) {
    %c0_i32 = arith.constant 0 : i32
    %c0_i32_0 = arith.constant 0 : i32
    %c0_i32_1 = arith.constant 0 : i32
    return %arg0, %c0_i32, %c0_i32_0 : i32, i32, i32
  }
  func.func @transform_7(%arg0: i32) -> (i32, i32) {
    %c0_i32 = arith.constant 0 : i32
    %c0_i32_0 = arith.constant 0 : i32
    return %c0_i32, %arg0 : i32, i32
  }
}

</mosaic_0001>

<bundles_post_ra>
// kernel: vae_loss.1
= control target key start
LH: loop header
LB: loop body
LE: loop exit
PB: predicated region body
PF: predicated region fallthrough
CT: control target
= control target key end

     0   :  { %s232_s0 = inlined_call_operand.vmem [shape: f32[8,8], index: 0, kind: input, shape index: {}]   ;;  %s233_s1 = inlined_call_operand.vmem [shape: f32[8,8], index: 1, kind: input, shape index: {}]   ;;  %s234_s2 = inlined_call_operand.vmem [shape: f32[8,32], index: 2, kind: input, shape index: {}]   ;;  %s235_s3 = inlined_call_operand.vmem [shape: f32[8,32], index: 3, kind: input, shape index: {}]   ;;  %s236_s4 = inlined_call_operand.vmem [shape: f32[3,8], index: 4, kind: input, shape index: {}]   ;;  %s237_s5 = inlined_call_operand.vmem [shape: f32[3,8], index: 5, kind: input, shape index: {}]   ;;  %s238_s6 = inlined_call_operand.vmem [shape: f32[1,8,128], index: 6, kind: output, shape index: {0}]   ;;  %s239_s7 = inlined_call_operand.hbm [shape: f32[3,8], index: 7, kind: output, shape index: {1}]  }
   0x1   :  { %v26_v0 = vld [vmem:[%s232_s0] sm:$0xff] }
   0x2   :  { %v27_v1 = vld [vmem:[%s233_s1] sm:$0xff] }
   0x3   :  { %v30_v2 = vsub.f32 %v26_v0, %v27_v1  ;;  %v29_v3 = vld [vmem:[%s235_s3] sm:$0xff] }
   0x4   :  { %13 = vsyncpa [#allocation3], 0  ;;  %vm32_vm0 = vcmask 64512   ;;  %v46_v4 = vmul.f32 1.442695, %v29_v3  ;;  %v28_v6 = vld [vmem:[%s234_s2] sm:$0xff] }
   0x5   :  { %v31_v5 = vmul.f32 %v30_v2, %v30_v2  ;;  %v43_v8 = vadd.f32 1.0, %v29_v3  ;;  %v44_v9 = vmul.f32 %v28_v6, %v28_v6  ;;  %vm49_vm1 = vcmask 261120   ;;  %v74_v14 = vld [vmem:[%s236_s4] sm:$0x7]  ;;  %s155_s2 = smov [#allocation2]  }
   0x6   :  { %125 = vpow2.f32 %v46_v4  ;;  %v75_v15 = vld [vmem:[%s237_s5] sm:$0x7]  ;;  %v76_v16 = vmul.f32 %v74_v14, %v74_v14  ;;  %vm77_vm2 = vcmask 59392   ;;  %s110_s4 = sshll.u32 %s155_s2, 4  ;;  %s111_s4 = int_to_ptr.vmem [resolvable:$true] %s110_s4 }
   0x7   :  { %v33_v7 = vsel %vm32_vm0, %v31_v5, 0.0  ;;  %v45_v10 = vsub.f32 %v43_v8, %v44_v9  ;;  %v87_v17 = vmul.f32 %v75_v15, %v75_v15  ;;  %s131_s5 = scalar_lea.vmem %s111_s4, 64  ;;  %p136_p1 = scmp.lt.s32.totalorder %s111_s4, %s111_s4 }
   0x8   :  { %34 = vadd.xlane.f32.xlu0 %v33_v7  ;;  %v78_v18 = vsel %vm77_vm2, %v76_v16, 0.0  ;;  %p132_p0 = scmp.ne.s32.totalorder %s111_s4, %s131_s5  ;;  %p137_p2 = scmp.lt.s32.totalorder %s131_s5, %s131_s5 }
   0x9   :  { %v88_v19 = vsel %vm77_vm2, %v87_v17, 0.0  ;;  %v79_v20 = vrot.slane %v78_v18, 4 }
   0xa   :  { %v89_v21 = vrot.slane %v88_v19, 4  ;;  %p138_p3 = por %p137_p2, %p136_p1 }
   0xb   :  { %v80_v22 = vadd.f32 %v79_v20, %v78_v18 }
   0xc   :  { %v90_v23 = vadd.f32 %v89_v21, %v88_v19  ;;  %p139_p4 = pnand %p138_p3, %p132_p0 }
   0xd   :  { %v81_v24 = vrot.slane %v80_v22, 2 }
   0xe   :  { %v91_v25 = vrot.slane %v90_v23, 2 }
   0xf   :  { %v82_v26 = vadd.f32 %v81_v24, %v80_v22 }
  0x10   :  { %v126_v11 = vpop.eup %125  ;;  %v92_v27 = vadd.f32 %v91_v25, %v90_v23 }
  0x11   :  { %v48_v12 = vsub.f32 %v45_v10, %v126_v11  ;;  %v83_v28 = vrot.slane %v82_v26, 1 }
  0x12   :  { %v93_v29 = vrot.slane %v92_v27, 1 }
  0x13   :  { %v50_v13 = vsel %vm49_vm1, %v48_v12, 0.0  ;;  %v84_v30 = vadd.f32 %v83_v28, %v82_v26 }
  0x14   :  { %51 = vadd.xlane.f32.xlu0 %v50_v13  ;;  %v94_v31 = vadd.f32 %v93_v29, %v92_v27 }
  0x15   :  { %127 = vrsqrt.f32 %v84_v30 }
  0x16   :  { %129 = vrsqrt.f32 %v94_v31 }
  0x1f   :  { %v128_v32 = vpop.eup %127 }
  0x20   :  { %v130_v33 = vpop.eup %129  ;;  %v86_v34 = vmin.f32 %v128_v32, 1e+12 }
  0x21   :  { %v96_v35 = vmin.f32 %v130_v33, 1e+12 }
  0x22   :  { %v97_v36 = vmul.f32 %v86_v34, %v74_v14 }
  0x23   :  { %v98_v37 = vmul.f32 %v96_v35, %v75_v15 }
  0x25   :  { %v99_v38 = vsub.f32 %v97_v36, %v98_v37 }
  0x27   :  { %v100_v39 = vand.u32 2147483647, %v99_v38 }
  0x29   :  { %101 = vst.msk [vmem:[#allocation2] sm:$0x7] %vm77_vm2, %v100_v39 }
  0x2a   :  { %142 = shalt.err (!%p139_p4)
}
  0x2b   :  { %s143_s12 = scalar_lea.hbm %s239_s7, 64 }
  0x2c   :  { %p144_p5 = scmp.ne.s32.totalorder %s239_s7, %s143_s12  ;;  %p147_p6 = scmp.lt.u32.totalorder %s143_s12, %s239_s7 }
  0x2e   :  { %p149_p7 = pnand %p147_p6, %p144_p5 }
  0x30   :  { %152 = shalt.err (!%p149_p7)
}
  0x31   :  { %113 = dma.vmem_to_hbm [thread:$0]  %s111_s4, 64, %s239_s7, [#allocation3]   ;;  %v60_v54 = vlaneseq }
  0x33   :  { %v61_v55 = vshrl.u32 %v60_v54, 7  ;;  %v63_v56 = vand.u32 127, %v60_v54 }
  0x35   :  { %vm64_vm3 = vcmp.eq.s32.totalorder %v61_v55, 0  ;;  %vm67_vm4 = vcmp.eq.s32.totalorder %v63_v56, 1  ;;  %vm65_vm5 = vcmp.eq.s32.totalorder %v63_v56, 0 }
  0x36   :  { %vm68_vm6 = vmand %vm64_vm3, %vm67_vm4 }
  0x37   :  { %vm66_vm7 = vmand %vm64_vm3, %vm65_vm5 }
  0x95   :  { %v35_v40 = vpop.xlane.xlu0 %34 }
  0x96   :  { %v36_v41 = vrot.slane %v35_v40, 4 }
  0x98   :  { %v37_v42 = vadd.f32 %v36_v41, %v35_v40 }
  0x9a   :  { %v38_v43 = vrot.slane %v37_v42, 2 }
  0x9c   :  { %v39_v44 = vadd.f32 %v38_v43, %v37_v42 }
  0x9e   :  { %v40_v45 = vrot.slane %v39_v44, 1 }
  0xa0   :  { %v41_v46 = vadd.f32 %v40_v45, %v39_v44 }
  0xa1   :  { %v52_v47 = vpop.xlane.xlu0 %51 }
  0xa2   :  { %v53_v48 = vrot.slane %v52_v47, 4  ;;  %120 = vpush %v41_v46 }
  0xa4   :  { %v54_v49 = vadd.f32 %v53_v48, %v52_v47 }
  0xa6   :  { %v55_v50 = vrot.slane %v54_v49, 2 }
  0xa8   :  { %v56_v51 = vadd.f32 %v55_v50, %v54_v49 }
  0xaa   :  { %v57_v52 = vrot.slane %v56_v51, 1 }
  0xac   :  { %v58_v53 = vadd.f32 %v57_v52, %v56_v51 }
  0xae   :  { %122 = vpush %v58_v53 }
  0xd3   :  { %s121_s7 = spop %120 }
  0xd4   :  { %v71_v58 = vstv %s121_s7 }
  0xdf   :  { %s123_s19 = spop %122 }
  0xe0   :  { %v69_v57 = vstv %s123_s19 }
  0xe1   :  { %v70_v59 = vsel %vm68_vm6, %v69_v57, 0.0 }
  0xe2   :  { %v72_v60 = vsel %vm66_vm7, %v71_v58, %v70_v59 }
  0xe3   :  { %73 = vst [vmem:[%s238_s6] sm:$0xff] %v72_v60 }
  0xe4   :  { %153 = dma.done.wait [#allocation3], 64  }
  0xe5   :  { %154 = vsyncadd [#allocation3], 4294967232 }
  0xe6   :  { %119 = vsyncpa [#allocation3], 1 }

</bundles_post_ra>
